<compile_context>
chip_gen: v7x
topology: tpu7x:2x2x1
jax: 0.10.0
libtpu: 0.0.40
codegen_flags: <defaults>
</compile_context>

<pallas_src>
import functools

import jax
import jax.numpy as jnp
from jax.experimental import pallas as pl
from jax.experimental.pallas import tpu as pltpu


# ----------------------------------------------------------------------------- kernel
def _gcrn_step_kernel(k_ref, xzr_ref, xu_ref, static_ref, init_ref,
                      s_stack_ref, w_hzr_ref, w_hu_ref, mask_ref,
                      out_ref, h_last_ref,
                      state_ref,
                      *, cheb_k, node_num, dim_out, batch_block):
    """One recurrent step for a [batch_block*N, Dout] hidden-state slab."""
    t = pl.program_id(1)
    BN = batch_block * node_num
    D = dim_out

    # (re)initialise the recurrent state at the start of every batch block
    @pl.when(t == 0)
    def _():
        state_ref[...] = init_ref[...]

    h = state_ref[...]                         # [BN, D]
    kval = k_ref[0, 0]                         # scalar blend coefficient (SMEM)
    mask = mask_ref[...]                       # [BN, N*D] precomputed block-diag mask

    def agc_h(v):
        # adaptive (per-node) graph convolution of an h-shaped input, all batches and
        # all Chebyshev orders fused:
        #   out[bn, o] = sum_k sum_c (S_k @ v_b)[n, c] * W[k, n*D + c, o]
        # S matmul for every k at once via kron(I_B, S_k) stacked over k:
        y_all = jnp.dot(s_stack_ref[...], v,
                        preferred_element_type=jnp.float32)          # [K*BN, D]
        blocks = []
        for ck in range(cheb_k):
            y_k = y_all[ck * BN:(ck + 1) * BN, :]                    # [BN, D]
            blocks.append(jnp.tile(y_k, (1, node_num)) * mask)       # [BN, N*D]
        return jnp.concatenate(blocks, axis=1)                       # [BN, K*N*D]

    # z / r gates share the input h -> one fused weight matmul with 2*D output lanes
    zr = jax.nn.sigmoid(
        xzr_ref[...] + jnp.dot(agc_h(h), w_hzr_ref[...],
                               preferred_element_type=jnp.float32))  # [BN, 2D]
    z = zr[:, :D]
    r = zr[:, D:]

    # candidate uses z*h -> its own agc
    hc = jnp.tanh(
        xu_ref[...] + jnp.dot(agc_h(z * h), w_hu_ref[...],
                              preferred_element_type=jnp.float32))   # [BN, D]

    h_new = r * h + (1.0 - r) * hc
    state_ref[...] = h_new

    # blend with the (hoisted) static branch
    out_ref[...] = kval * h_new + (1.0 - kval) * static_ref[...]

    @pl.when(t == pl.num_programs(1) - 1)
    def _():
        h_last_ref[...] = h_new


# ----------------------------------------------------------------------- per-layer call
def _run_gcrn_layer(kval, xzr_pre, xu_pre, static, init_state,
                    s_stack, w_hzr, w_hu, mask,
                    *, cheb_k, node_num, dim_out, batch_block):
    NB, T, BN, _ = xzr_pre.shape
    D = dim_out
    K = cheb_k
    N = node_num

    kernel = functools.partial(_gcrn_step_kernel, cheb_k=K, node_num=N,
                               dim_out=D, batch_block=batch_block)

    grid_spec = pltpu.PrefetchScalarGridSpec(
        num_scalar_prefetch=0,
        grid=(NB, T),
        in_specs=[
            pl.BlockSpec(memory_space=pltpu.MemorySpace.SMEM),                 # k (scalar)
            pl.BlockSpec((None, None, BN, 2 * D), lambda i, t: (i, t, 0, 0)),  # x-path z|r pre
            pl.BlockSpec((None, None, BN, D), lambda i, t: (i, t, 0, 0)),      # x-path cand pre
            pl.BlockSpec((None, None, BN, D), lambda i, t: (i, t, 0, 0)),      # static branch
            pl.BlockSpec((None, BN, D), lambda i, t: (i, 0, 0)),               # init state
            pl.BlockSpec((K * BN, BN), lambda i, t: (0, 0)),                   # kron supports
            pl.BlockSpec((K * N * D, 2 * D), lambda i, t: (0, 0)),             # W_h (z|r) fused
            pl.BlockSpec((K * N * D, D), lambda i, t: (0, 0)),                 # W_h candidate
            pl.BlockSpec((BN, N * D), lambda i, t: (0, 0)),                    # block-diag mask
        ],
        out_specs=[
            pl.BlockSpec((None, None, BN, D), lambda i, t: (i, t, 0, 0)),      # per-step outputs
            pl.BlockSpec((None, BN, D), lambda i, t: (i, 0, 0)),               # last hidden
        ],
        scratch_shapes=[pltpu.VMEM((BN, D), jnp.float32)],                     # recurrent state
    )

    out, h_last = pl.pallas_call(
        kernel,
        grid_spec=grid_spec,
        out_shape=(
            jax.ShapeDtypeStruct((NB, T, BN, D), jnp.float32),
            jax.ShapeDtypeStruct((NB, BN, D), jnp.float32),
        ),
        compiler_params=pltpu.CompilerParams(
            dimension_semantics=("parallel", "arbitrary")),
    )(kval, xzr_pre, xu_pre, static, init_state, s_stack, w_hzr, w_hu, mask)
    return out, h_last


# ----------------------------------------------------------------------------- wrapper
def gcrn_forward(x, init_state, node_embeddings, adj, ratio, params, *, batch_block=None):
    """Pallas GCRN forward. Mirrors GCRN.forward(x, init_state, node_embeddings, adj, ratio)."""
    B, T, N, _ = x.shape
    cheb_k = params["cheb_k"]
    adpc = params["adpc"]
    dim_out = init_state.shape[-1]
    D = dim_out

    if batch_block is None:
        batch_block = B                    # fold the whole batch into one block
    assert B % batch_block == 0
    BB = batch_block
    NB = B // BB
    BN = BB * N

    # Chebyshev supports from node embeddings (one-off glue, plain JAX)
    s1 = jax.nn.softmax(jax.nn.relu(node_embeddings @ node_embeddings.T), axis=1)
    support_set = [jnp.eye(N, dtype=jnp.float32), s1]
    for _ in range(2, cheb_k):
        support_set.append(2.0 * s1 @ support_set[-1] - support_set[-2])
    supports = jnp.stack(support_set, axis=0)                                   # [K, N, N]

    # kron(I_BB, S_k) stacked over k -> one [K*BN, BN] matrix so a single MXU matmul
    # applies all Chebyshev supports to all batch elements.
    eye_bb = jnp.eye(BB, dtype=jnp.float32)
    s_big = jnp.einsum('ab,knm->kanbm', eye_bb, supports).reshape(cheb_k, BN, BN)
    s_stack = s_big.reshape(cheb_k * BN, BN)

    # Precomputed block-diagonal expansion mask: mask[b*N+n, m*D+c] = (m == n)
    n_idx = jnp.arange(BN, dtype=jnp.int32) % N
    m_idx = jnp.arange(N * D, dtype=jnp.int32) // D
    mask = (m_idx[None, :] == n_idx[:, None]).astype(jnp.float32)               # [BN, N*D]

    kval = jnp.asarray(adpc + (1.0 - adpc) * ratio, jnp.float32).reshape(1, 1)

    def to_blocks(a):   # [B, T, N, C] -> [NB, T, BB*N, C]
        C = a.shape[-1]
        return (a.reshape(NB, BB, T, N, C)
                 .transpose(0, 2, 1, 3, 4)
                 .reshape(NB, T, BN, C))

    def from_blocks(a):  # [NB, T, BB*N, C] -> [B, T, N, C]
        C = a.shape[-1]
        return (a.reshape(NB, T, BB, N, C)
                 .transpose(0, 2, 1, 3, 4)
                 .reshape(B, T, N, C))

    current = x
    output_hidden = []
    for i, layer in enumerate(params["layers"]):
        d_in = current.shape[-1]

        # node-adaptive weights / biases from the embedding pools (one-off glue)
        wg = jnp.einsum('nd,dkio->nkio', node_embeddings, layer["gate_w_pool"])   # [N,K,Din+D,2D]
        bg = node_embeddings @ layer["gate_b_pool"]                               # [N, 2D]
        wu = jnp.einsum('nd,dkio->nkio', node_embeddings, layer["update_w_pool"]) # [N,K,Din+D,D]
        bu = node_embeddings @ layer["update_b_pool"]                             # [N, D]

        w_x_gate = wg[:, :, :d_in, :]   # [N, K, Din, 2D]
        w_h_gate = wg[:, :, d_in:, :]   # [N, K, D, 2D]
        w_x_up = wu[:, :, :d_in, :]     # [N, K, Din, D]
        w_h_up = wu[:, :, d_in:, :]     # [N, K, D, D]

        # ---- hoisted x-path graph convolution (batched over B*T, full MXU fill) ----
        x_g = jnp.einsum('knm,btmc->btknc', supports, current)
        xzr_pre = jnp.einsum('btknc,nkco->btno', x_g, w_x_gate) + bg              # [B,T,N,2D]
        xu_pre = jnp.einsum('btknc,nkco->btno', x_g, w_x_up) + bu                 # [B,T,N,D]

        # ---- hoisted static branch: nconv(x, adj) (+ layer-0 Linear) ----
        static = jnp.einsum('btvc,vw->btwc', current, adj)
        if i == 0:
            static = static @ params["linear_w"].T + params["linear_b"]           # [B,T,N,D]

        # ---- fused, flattened per-node h-path weights: [K*N*D, out] ----
        w_hzr = jnp.transpose(w_h_gate, (1, 0, 2, 3)).reshape(cheb_k * N * D, 2 * D)
        w_hu = jnp.transpose(w_h_up, (1, 0, 2, 3)).reshape(cheb_k * N * D, D)

        init_b = init_state[i].reshape(NB, BN, D)

        out_b, h_last_b = _run_gcrn_layer(
            kval, to_blocks(xzr_pre), to_blocks(xu_pre), to_blocks(static),
            init_b, s_stack, w_hzr, w_hu, mask,
            cheb_k=cheb_k, node_num=N, dim_out=D, batch_block=BB)

        current = from_blocks(out_b)
        output_hidden.append(h_last_b.reshape(B, N, D))
    return current, output_hidden


# ----------------------------------------------------------------- pure-JAX reference
def gcrn_forward_ref(x, init_state, node_embeddings, adj, ratio, params):
    B, T, N, _ = x.shape
    cheb_k = params["cheb_k"]
    adpc = params["adpc"]
    dim_out = init_state.shape[-1]

    s1 = jax.nn.softmax(jax.nn.relu(node_embeddings @ node_embeddings.T), axis=1)
    support_set = [jnp.eye(N, dtype=jnp.float32), s1]
    for _ in range(2, cheb_k):
        support_set.append(2.0 * s1 @ support_set[-1] - support_set[-2])
    supports = jnp.stack(support_set, axis=0)

    k = adpc + (1.0 - adpc) * ratio

    def avwgcn(v, w_pool, b_pool):
        weights = jnp.einsum('nd,dkio->nkio', node_embeddings, w_pool)
        bias = node_embeddings @ b_pool
        x_g = jnp.einsum('knm,bmc->bknc', supports, v)
        x_g = jnp.transpose(x_g, (0, 2, 1, 3))
        return jnp.einsum('bnki,nkio->bno', x_g, weights) + bias

    current = x
    output_hidden = []
    for i, layer in enumerate(params["layers"]):
        state = init_state[i]
        inner = []
        for t in range(T):
            xt = current[:, t]
            cat = jnp.concatenate([xt, state], axis=-1)
            z_r = jax.nn.sigmoid(avwgcn(cat, layer["gate_w_pool"], layer["gate_b_pool"]))
            z, r = z_r[..., :dim_out], z_r[..., dim_out:]
            cand = jnp.concatenate([xt, z * state], axis=-1)
            hc = jnp.tanh(avwgcn(cand, layer["update_w_pool"], layer["update_b_pool"]))
            state = r * state + (1.0 - r) * hc
            static = jnp.einsum('bvc,vw->bwc', xt, adj)             # nconv
            if i == 0:
                static = static @ params["linear_w"].T + params["linear_b"]
            inner.append(k * state + (1.0 - k) * static)
        output_hidden.append(state)
        current = jnp.stack(inner, axis=1)
    return current, output_hidden


# --------------------------------------------------------------------------------- main
if __name__ == "__main__":
    key = jax.random.PRNGKey(0)
    B, T, N = 2, 4, 8
    dim_in, dim_out, embed_dim, cheb_k, num_layers = 2, 8, 4, 2, 2
    adpc = 0.6

    keys = jax.random.split(key, 16)
    x = jax.random.normal(keys[0], (B, T, N, dim_in), jnp.float32)
    init_state = 0.1 * jax.random.normal(keys[1], (num_layers, B, N, dim_out), jnp.float32)
    node_embeddings = jax.random.normal(keys[2], (N, embed_dim), jnp.float32)
    adj = jax.nn.softmax(jax.random.normal(keys[3], (N, N), jnp.float32), axis=1)
    ratio = jnp.float32(0.3)

    layers = []
    kidx = 4
    for i in range(num_layers):
        d_in = dim_in if i == 0 else dim_out
        layers.append(dict(
            gate_w_pool=0.1 * jax.random.normal(
                keys[kidx], (embed_dim, cheb_k, d_in + dim_out, 2 * dim_out), jnp.float32),
            gate_b_pool=0.1 * jax.random.normal(
                keys[kidx + 1], (embed_dim, 2 * dim_out), jnp.float32),
            update_w_pool=0.1 * jax.random.normal(
                keys[kidx + 2], (embed_dim, cheb_k, d_in + dim_out, dim_out), jnp.float32),
            update_b_pool=0.1 * jax.random.normal(
                keys[kidx + 3], (embed_dim, dim_out), jnp.float32),
        ))
        kidx += 4
    params = dict(
        layers=layers, cheb_k=cheb_k, adpc=adpc,
        linear_w=0.1 * jax.random.normal(keys[12], (dim_out, dim_in), jnp.float32),
        linear_b=0.1 * jax.random.normal(keys[13], (dim_out,), jnp.float32),
    )

    out, hidden = gcrn_forward(x, init_state, node_embeddings, adj, ratio, params)
    out = jax.block_until_ready(out)

    ref_out, ref_hidden = gcrn_forward_ref(x, init_state, node_embeddings, adj, ratio, params)
    assert out.shape == (B, T, N, dim_out)
    assert jnp.allclose(out, ref_out, atol=1e-2, rtol=1e-2), "sequence output mismatch"
    for h, hr in zip(hidden, ref_hidden):
        assert h.shape == (B, N, dim_out)
        assert jnp.allclose(h, hr, atol=1e-2, rtol=1e-2), "hidden state mismatch"

    print("KERNEL_OK")
</pallas_src>

<mosaic_0001>
module attributes {stable_mosaic.version = 11 : i64} {
  func.func @_gcrn_step_kernel(%arg0: i32, %arg1: i32, %arg2: memref<1x1xf32, #tpu.memory_space<smem>>, %arg3: memref<1x1x16x16xf32, #tpu.memory_space<vmem>>, %arg4: memref<1x1x16x8xf32, #tpu.memory_space<vmem>>, %arg5: memref<1x1x16x8xf32, #tpu.memory_space<vmem>>, %arg6: memref<1x16x8xf32, #tpu.memory_space<vmem>>, %arg7: memref<32x16xf32, #tpu.memory_space<vmem>>, %arg8: memref<128x16xf32, #tpu.memory_space<vmem>>, %arg9: memref<128x8xf32, #tpu.memory_space<vmem>>, %arg10: memref<16x64xf32, #tpu.memory_space<vmem>>, %arg11: memref<1x1x16x8xf32, #tpu.memory_space<vmem>>, %arg12: memref<1x16x8xf32, #tpu.memory_space<vmem>>, %arg13: memref<16x8xf32, #tpu.memory_space<vmem>>) attributes {dimension_semantics = [#tpu.dimension_semantics<parallel>, #tpu.dimension_semantics<arbitrary>], iteration_bounds = array<i64: 1, 4>, scalar_prefetch = 0 : i64, scratch_operands = 1 : i64, tpu.core_type = #tpu.core_type<tc>, window_params = [{transform_indices = @transform_0, window_bounds = array<i64: 1, 1>}, {transform_indices = @transform_1, window_bounds = array<i64: 1, 1, 16, 16>}, {transform_indices = @transform_2, window_bounds = array<i64: 1, 1, 16, 8>}, {transform_indices = @transform_3, window_bounds = array<i64: 1, 1, 16, 8>}, {transform_indices = @transform_4, window_bounds = array<i64: 1, 16, 8>}, {pipeline_mode = #tpu.pipeline_mode<synchronous>, transform_indices = @transform_5, window_bounds = array<i64: 32, 16>}, {pipeline_mode = #tpu.pipeline_mode<synchronous>, transform_indices = @transform_6, window_bounds = array<i64: 128, 16>}, {pipeline_mode = #tpu.pipeline_mode<synchronous>, transform_indices = @transform_7, window_bounds = array<i64: 128, 8>}, {pipeline_mode = #tpu.pipeline_mode<synchronous>, transform_indices = @transform_8, window_bounds = array<i64: 16, 64>}, {transform_indices = @transform_9, window_bounds = array<i64: 1, 1, 16, 8>}, {transform_indices = @transform_10, window_bounds = array<i64: 1, 16, 8>}]} {
    %c0_i32 = arith.constant 0 : i32
    %0 = arith.cmpi eq, %arg1, %c0_i32 : i32
    %1 = arith.extui %0 : i1 to i32
    %c0_i32_0 = arith.constant 0 : i32
    %2 = arith.cmpi ne, %1, %c0_i32_0 : i32
    scf.if %2 {
      %c0_39 = arith.constant 0 : index
      %c0_40 = arith.constant 0 : index
      %c0_41 = arith.constant 0 : index
      %63 = vector.load %arg6[%c0_39, %c0_40, %c0_41] : memref<1x16x8xf32, #tpu.memory_space<vmem>>, vector<1x16x8xf32>
      %64 = vector.shape_cast %63 : vector<1x16x8xf32> to vector<16x8xf32>
      %c0_42 = arith.constant 0 : index
      %c0_43 = arith.constant 0 : index
      %65 = vector.load %arg13[%c0_42, %c0_43] : memref<16x8xf32, #tpu.memory_space<vmem>>, vector<16x8xf32>
      tpu.vector_store %arg13[%c0_42, %c0_43], %64 {strides = array<i32>} : memref<16x8xf32, #tpu.memory_space<vmem>>, vector<16x8xf32>,
    } else {
    }
    %c0 = arith.constant 0 : index
    %c0_1 = arith.constant 0 : index
    %3 = vector.load %arg13[%c0, %c0_1] : memref<16x8xf32, #tpu.memory_space<vmem>>, vector<16x8xf32>
    %c0_2 = arith.constant 0 : index
    %c0_3 = arith.constant 0 : index
    %4 = memref.load %arg2[%c0_2, %c0_3] : memref<1x1xf32, #tpu.memory_space<smem>>
    %c0_4 = arith.constant 0 : index
    %c0_5 = arith.constant 0 : index
    %5 = vector.load %arg10[%c0_4, %c0_5] : memref<16x64xf32, #tpu.memory_space<vmem>>, vector<16x64xf32>
    %c0_6 = arith.constant 0 : index
    %c0_7 = arith.constant 0 : index
    %c0_8 = arith.constant 0 : index
    %c0_9 = arith.constant 0 : index
    %6 = vector.load %arg3[%c0_6, %c0_7, %c0_8, %c0_9] : memref<1x1x16x16xf32, #tpu.memory_space<vmem>>, vector<1x1x16x16xf32>
    %7 = vector.shape_cast %6 : vector<1x1x16x16xf32> to vector<16x16xf32>
    %c0_10 = arith.constant 0 : index
    %c0_11 = arith.constant 0 : index
    %8 = vector.load %arg7[%c0_10, %c0_11] : memref<32x16xf32, #tpu.memory_space<vmem>>, vector<32x16xf32>
    %cst = arith.constant dense<0.000000e+00> : vector<32x8xf32>
    %9 = tpu.matmul %8, %3, %cst {dimension_numbers = #tpu.dot_dimension_numbers<[1], [0], [0], [1], [0, 0, 1, 1], [], []>} : vector<32x16xf32>, vector<16x8xf32>, vector<32x8xf32> -> vector<32x8xf32>
    %10 = vector.extract_strided_slice %9 {offsets = [0, 0], sizes = [16, 8], strides = [1, 1]} : vector<32x8xf32> to vector<16x8xf32>
    %11 = tpu.concatenate %10, %10, %10, %10, %10, %10, %10, %10 in 1 : vector<16x8xf32>, vector<16x8xf32>, vector<16x8xf32>, vector<16x8xf32>, vector<16x8xf32>, vector<16x8xf32>, vector<16x8xf32>, vector<16x8xf32> -> vector<16x64xf32>
    %12 = arith.mulf %11, %5 : vector<16x64xf32>
    %13 = vector.extract_strided_slice %9 {offsets = [16, 0], sizes = [16, 8], strides = [1, 1]} : vector<32x8xf32> to vector<16x8xf32>
    %14 = tpu.concatenate %13, %13, %13, %13, %13, %13, %13, %13 in 1 : vector<16x8xf32>, vector<16x8xf32>, vector<16x8xf32>, vector<16x8xf32>, vector<16x8xf32>, vector<16x8xf32>, vector<16x8xf32>, vector<16x8xf32> -> vector<16x64xf32>
    %15 = arith.mulf %14, %5 : vector<16x64xf32>
    %16 = tpu.concatenate %12, %15 in 1 : vector<16x64xf32>, vector<16x64xf32> -> vector<16x128xf32>
    %c0_12 = arith.constant 0 : index
    %c0_13 = arith.constant 0 : index
    %17 = vector.load %arg8[%c0_12, %c0_13] : memref<128x16xf32, #tpu.memory_space<vmem>>, vector<128x16xf32>
    %cst_14 = arith.constant dense<0.000000e+00> : vector<16x16xf32>
    %18 = tpu.matmul %16, %17, %cst_14 {dimension_numbers = #tpu.dot_dimension_numbers<[1], [0], [0], [1], [0, 0, 1, 1], [], []>} : vector<16x128xf32>, vector<128x16xf32>, vector<16x16xf32> -> vector<16x16xf32>
    %19 = arith.addf %7, %18 : vector<16x16xf32>
    %20 = arith.negf %19 : vector<16x16xf32>
    %21 = math.exp %20 : vector<16x16xf32>
    %cst_15 = arith.constant 1.000000e+00 : f32
    %22 = vector.broadcast %cst_15 : f32 to vector<16x16xf32>
    %23 = arith.addf %22, %21 : vector<16x16xf32>
    %24 = arith.divf %22, %23 : vector<16x16xf32>
    %25 = vector.extract_strided_slice %24 {offsets = [0, 0], sizes = [16, 8], strides = [1, 1]} : vector<16x16xf32> to vector<16x8xf32>
    %26 = vector.extract_strided_slice %24 {offsets = [0, 8], sizes = [16, 8], strides = [1, 1]} : vector<16x16xf32> to vector<16x8xf32>
    %c0_16 = arith.constant 0 : index
    %c0_17 = arith.constant 0 : index
    %c0_18 = arith.constant 0 : index
    %c0_19 = arith.constant 0 : index
    %27 = vector.load %arg4[%c0_16, %c0_17, %c0_18, %c0_19] : memref<1x1x16x8xf32, #tpu.memory_space<vmem>>, vector<1x1x16x8xf32>
    %28 = vector.shape_cast %27 : vector<1x1x16x8xf32> to vector<16x8xf32>
    %29 = arith.mulf %25, %3 : vector<16x8xf32>
    %c0_20 = arith.constant 0 : index
    %c0_21 = arith.constant 0 : index
    %30 = vector.load %arg7[%c0_20, %c0_21] : memref<32x16xf32, #tpu.memory_space<vmem>>, vector<32x16xf32>
    %cst_22 = arith.constant dense<0.000000e+00> : vector<32x8xf32>
    %31 = tpu.matmul %30, %29, %cst_22 {dimension_numbers = #tpu.dot_dimension_numbers<[1], [0], [0], [1], [0, 0, 1, 1], [], []>} : vector<32x16xf32>, vector<16x8xf32>, vector<32x8xf32> -> vector<32x8xf32>
    %32 = vector.extract_strided_slice %31 {offsets = [0, 0], sizes = [16, 8], strides = [1, 1]} : vector<32x8xf32> to vector<16x8xf32>
    %33 = tpu.concatenate %32, %32, %32, %32, %32, %32, %32, %32 in 1 : vector<16x8xf32>, vector<16x8xf32>, vector<16x8xf32>, vector<16x8xf32>, vector<16x8xf32>, vector<16x8xf32>, vector<16x8xf32>, vector<16x8xf32> -> vector<16x64xf32>
    %34 = arith.mulf %33, %5 : vector<16x64xf32>
    %35 = vector.extract_strided_slice %31 {offsets = [16, 0], sizes = [16, 8], strides = [1, 1]} : vector<32x8xf32> to vector<16x8xf32>
    %36 = tpu.concatenate %35, %35, %35, %35, %35, %35, %35, %35 in 1 : vector<16x8xf32>, vector<16x8xf32>, vector<16x8xf32>, vector<16x8xf32>, vector<16x8xf32>, vector<16x8xf32>, vector<16x8xf32>, vector<16x8xf32> -> vector<16x64xf32>
    %37 = arith.mulf %36, %5 : vector<16x64xf32>
    %38 = tpu.concatenate %34, %37 in 1 : vector<16x64xf32>, vector<16x64xf32> -> vector<16x128xf32>
    %c0_23 = arith.constant 0 : index
    %c0_24 = arith.constant 0 : index
    %39 = vector.load %arg9[%c0_23, %c0_24] : memref<128x8xf32, #tpu.memory_space<vmem>>, vector<128x8xf32>
    %cst_25 = arith.constant dense<0.000000e+00> : vector<16x8xf32>
    %40 = tpu.matmul %38, %39, %cst_25 {dimension_numbers = #tpu.dot_dimension_numbers<[1], [0], [0], [1], [0, 0, 1, 1], [], []>} : vector<16x128xf32>, vector<128x8xf32>, vector<16x8xf32> -> vector<16x8xf32>
    %41 = arith.addf %28, %40 : vector<16x8xf32>
    %42 = math.tanh %41 : vector<16x8xf32>
    %43 = arith.mulf %26, %3 : vector<16x8xf32>
    %cst_26 = arith.constant 1.000000e+00 : f32
    %44 = vector.broadcast %cst_26 : f32 to vector<16x8xf32>
    %45 = arith.subf %44, %26 : vector<16x8xf32>
    %46 = arith.mulf %45, %42 : vector<16x8xf32>
    %47 = arith.addf %43, %46 : vector<16x8xf32>
    %c0_27 = arith.constant 0 : index
    %c0_28 = arith.constant 0 : index
    %48 = vector.load %arg13[%c0_27, %c0_28] : memref<16x8xf32, #tpu.memory_space<vmem>>, vector<16x8xf32>
    tpu.vector_store %arg13[%c0_27, %c0_28], %47 {strides = array<i32>} : memref<16x8xf32, #tpu.memory_space<vmem>>, vector<16x8xf32>,
    %49 = vector.broadcast %4 : f32 to vector<16x8xf32>
    %50 = arith.mulf %49, %47 : vector<16x8xf32>
    %cst_29 = arith.constant 1.000000e+00 : f32
    %51 = arith.subf %cst_29, %4 : f32
    %c0_30 = arith.constant 0 : index
    %c0_31 = arith.constant 0 : index
    %c0_32 = arith.constant 0 : index
    %c0_33 = arith.constant 0 : index
    %52 = vector.load %arg5[%c0_30, %c0_31, %c0_32, %c0_33] : memref<1x1x16x8xf32, #tpu.memory_space<vmem>>, vector<1x1x16x8xf32>
    %53 = vector.shape_cast %52 : vector<1x1x16x8xf32> to vector<16x8xf32>
    %54 = vector.broadcast %51 : f32 to vector<16x8xf32>
    %55 = arith.mulf %54, %53 : vector<16x8xf32>
    %56 = arith.addf %50, %55 : vector<16x8xf32>
    %c0_34 = arith.constant 0 : index
    %c0_35 = arith.constant 0 : index
    %c0_36 = arith.constant 0 : index
    %c0_37 = arith.constant 0 : index
    %57 = vector.load %arg11[%c0_34, %c0_35, %c0_36, %c0_37] : memref<1x1x16x8xf32, #tpu.memory_space<vmem>>, vector<1x1x16x8xf32>
    %58 = vector.shape_cast %57 : vector<1x1x16x8xf32> to vector<16x8xf32>
    %59 = vector.shape_cast %56 : vector<16x8xf32> to vector<1x1x16x8xf32>
    tpu.vector_store %arg11[%c0_34, %c0_35, %c0_36, %c0_37], %59 {strides = array<i32>} : memref<1x1x16x8xf32, #tpu.memory_space<vmem>>, vector<1x1x16x8xf32>,
    %c3_i32 = arith.constant 3 : i32
    %60 = arith.cmpi eq, %arg1, %c3_i32 : i32
    %61 = arith.extui %60 : i1 to i32
    %c0_i32_38 = arith.constant 0 : i32
    %62 = arith.cmpi ne, %61, %c0_i32_38 : i32
    scf.if %62 {
      %c0_39 = arith.constant 0 : index
      %c0_40 = arith.constant 0 : index
      %c0_41 = arith.constant 0 : index
      %63 = vector.load %arg12[%c0_39, %c0_40, %c0_41] : memref<1x16x8xf32, #tpu.memory_space<vmem>>, vector<1x16x8xf32>
      %64 = vector.shape_cast %63 : vector<1x16x8xf32> to vector<16x8xf32>
      %65 = vector.shape_cast %47 : vector<16x8xf32> to vector<1x16x8xf32>
      tpu.vector_store %arg12[%c0_39, %c0_40, %c0_41], %65 {strides = array<i32>} : memref<1x16x8xf32, #tpu.memory_space<vmem>>, vector<1x16x8xf32>,
    } else {
    }
    return
  }
  func.func @transform_0(%arg0: i32, %arg1: i32) -> (i32, i32) {
    %c0_i32 = arith.constant 0 : i32
    %c0_i32_0 = arith.constant 0 : i32
    %c0_i32_1 = arith.constant 0 : i32
    return %c0_i32, %c0_i32_0 : i32, i32
  }
  func.func @transform_1(%arg0: i32, %arg1: i32) -> (i32, i32, i32, i32) {
    %c0_i32 = arith.constant 0 : i32
    %c0_i32_0 = arith.constant 0 : i32
    %c0_i32_1 = arith.constant 0 : i32
    return %arg0, %arg1, %c0_i32, %c0_i32_0 : i32, i32, i32, i32
  }
  func.func @transform_2(%arg0: i32, %arg1: i32) -> (i32, i32, i32, i32) {
    %c0_i32 = arith.constant 0 : i32
    %c0_i32_0 = arith.constant 0 : i32
    %c0_i32_1 = arith.constant 0 : i32
    return %arg0, %arg1, %c0_i32, %c0_i32_0 : i32, i32, i32, i32
  }
  func.func @transform_3(%arg0: i32, %arg1: i32) -> (i32, i32, i32, i32) {
    %c0_i32 = arith.constant 0 : i32
    %c0_i32_0 = arith.constant 0 : i32
    %c0_i32_1 = arith.constant 0 : i32
    return %arg0, %arg1, %c0_i32, %c0_i32_0 : i32, i32, i32, i32
  }
  func.func @transform_4(%arg0: i32, %arg1: i32) -> (i32, i32, i32) {
    %c0_i32 = arith.constant 0 : i32
    %c0_i32_0 = arith.constant 0 : i32
    %c0_i32_1 = arith.constant 0 : i32
    return %arg0, %c0_i32, %c0_i32_0 : i32, i32, i32
  }
  func.func @transform_5(%arg0: i32, %arg1: i32) -> (i32, i32) {
    %c0_i32 = arith.constant 0 : i32
    %c0_i32_0 = arith.constant 0 : i32
    %c0_i32_1 = arith.constant 0 : i32
    return %c0_i32, %c0_i32_0 : i32, i32
  }
  func.func @transform_6(%arg0: i32, %arg1: i32) -> (i32, i32) {
    %c0_i32 = arith.constant 0 : i32
    %c0_i32_0 = arith.constant 0 : i32
    %c0_i32_1 = arith.constant 0 : i32
    return %c0_i32, %c0_i32_0 : i32, i32
  }
  func.func @transform_7(%arg0: i32, %arg1: i32) -> (i32, i32) {
    %c0_i32 = arith.constant 0 : i32
    %c0_i32_0 = arith.constant 0 : i32
    %c0_i32_1 = arith.constant 0 : i32
    return %c0_i32, %c0_i32_0 : i32, i32
  }
  func.func @transform_8(%arg0: i32, %arg1: i32) -> (i32, i32) {
    %c0_i32 = arith.constant 0 : i32
    %c0_i32_0 = arith.constant 0 : i32
    %c0_i32_1 = arith.constant 0 : i32
    return %c0_i32, %c0_i32_0 : i32, i32
  }
  func.func @transform_9(%arg0: i32, %arg1: i32) -> (i32, i32, i32, i32) {
    %c0_i32 = arith.constant 0 : i32
    %c0_i32_0 = arith.constant 0 : i32
    %c0_i32_1 = arith.constant 0 : i32
    return %arg0, %arg1, %c0_i32, %c0_i32_0 : i32, i32, i32, i32
  }
  func.func @transform_10(%arg0: i32, %arg1: i32) -> (i32, i32, i32) {
    %c0_i32 = arith.constant 0 : i32
    %c0_i32_0 = arith.constant 0 : i32
    %c0_i32_1 = arith.constant 0 : i32
    return %arg0, %c0_i32, %c0_i32_0 : i32, i32, i32
  }
}

</mosaic_0001>

<bundles_post_ra>
// kernel: tpu_custom_call.1
= control target key start
LH: loop header
LB: loop body
LE: loop exit
PB: predicated region body
PF: predicated region fallthrough
CT: control target
= control target key end

     0   :  { %s1810_s15 = smov 0   ;;  %s1812_s16 = smov 0   ;;  %s2263_s0 = inlined_call_operand.<no memory space> [shape: f32[1,1], index: 0, kind: input, shape index: {}]   ;;  %s2264_s1 = inlined_call_operand.vmem [shape: f32[1,4,16,16], index: 1, kind: input, shape index: {}]   ;;  %s2265_s2 = inlined_call_operand.vmem [shape: f32[1,4,16,8], index: 2, kind: input, shape index: {}]   ;;  %s2266_s3 = inlined_call_operand.vmem [shape: f32[1,4,16,8], index: 3, kind: input, shape index: {}]   ;;  %s2267_s4 = inlined_call_operand.vmem [shape: f32[1,16,8], index: 4, kind: input, shape index: {}]   ;;  %s2268_s5 = inlined_call_operand.vmem [shape: f32[32,16], index: 5, kind: input, shape index: {}]   ;;  %s2269_s6 = inlined_call_operand.vmem [shape: f32[128,16], index: 6, kind: input, shape index: {}]   ;;  %s2270_s7 = inlined_call_operand.vmem [shape: f32[128,8], index: 7, kind: input, shape index: {}]   ;;  %s2271_s8 = inlined_call_operand.vmem [shape: f32[16,64], index: 8, kind: input, shape index: {}]   ;;  %s2272_s9 = inlined_call_operand.vmem [shape: f32[1,4,16,8], index: 9, kind: output, shape index: {0}]   ;;  %s2273_s10 = inlined_call_operand.vmem [shape: f32[1,16,8], index: 10, kind: output, shape index: {1}]  }
   0x1   :  { %16 = sst [smem:[#allocation3]] %s2263_s0  ;;  %s1814_s17 = smov 0  }
   0x2 LB: > { %s31_s0 = sadd.s32 1, %s1737_s16  ;;  %p1426_p0 = scmp.ge.s32.totalorder %s1741_s17, 1  ;;  %s1741_s17 = sphi %s1814_s17, %s22_s17   ;;  %s1737_s16 = sphi %s1812_s16, %s2287_s16   ;;  %s1733_s15 = sphi %s1810_s15, %s2286_s15  }
   0x3   : > { %p32_p1 = scmp.ge.s32.totalorder %s31_s0, 4  ;;  %p378_p2 = scmp.lt.s32.totalorder %s1741_s17, 5 }
   0x5   : > { %s2289_s0 = smov (%p32_p1, %s31_s0), 0  ;;  %p379_p3 = pnand %p1426_p0, %p378_p2 }
   0x6   : > { %p454_p4 = scmp.lt.s32.totalorder (!%p379_p3), %s1733_s15, 3  ;;  %p1435_p5 = scmp.ne.s32.totalorder (!%p379_p3), %s1733_s15, 0 }
   0x7   : > { %382 = sbr.rel (%p379_p3) target bundleno = 1703 (0x6a7), region = 56 }
   0xe   : > { %s455_s18 = scalar_select %p454_p4, %s1733_s15, 3 }
   0xf   : > { %501 = sbr.rel (%p1435_p5) target bundleno = 22 (0x16), region = 60  ;;  %v502_v0 = vld [vmem:[%s2267_s4] sm:$0xff] (!%p1435_p5)  ;;  %vm504_vm0 = vcmask (!%p1435_p5), 64512   ;;  %v503_v1 = vld [vmem:[%s2267_s4 + $0x8] sm:$0xff] (!%p1435_p5) }
  0x10   : > { %s1450_s19 = sshll.u32 %s455_s18, 4  ;;  %505 = vst.msk [vmem:[#allocation2] sm:$0xff] (!%p1435_p5), %vm504_vm0, %v502_v0  ;;  %506 = vst.msk [vmem:[#allocation2 + $0x8] sm:$0xff] (!%p1435_p5), %vm504_vm0, %v503_v1 }
  0x11   : > { %s1835_s22 = scalar_lea.vmem %s2264_s1, %s1450_s19  ;;  %s1840_s25 = scalar_lea.vmem %s2265_s2, %s1450_s19 }
  0x12   : > { %s1845_s28 = scalar_lea.vmem %s2266_s3, %s1450_s19  ;;  %s1850_s11 = scalar_lea.vmem %s2272_s9, %s1450_s19 }
  0x16 PF: > { %v514_v4 = vld [vmem:[%s2268_s5] sm:$0xff]  ;;  %vm518_vm1 = vcmask 130048   ;;  %v1873_v6 = vld [vmem:[%s2268_s5 + $0x8] sm:$0xff]  ;;  %v1878_v7 = vld [vmem:[%s2268_s5 + $0x10] sm:$0xff]  ;;  %s2276_s30 = smov 16   ;;  %s2280_s12 = smov 8  }
  0x17   : > { %v1859_v2 = vld [vmem:[#allocation2] sm:$0xff]  ;;  %v1861_v3 = vld [vmem:[#allocation2 + $0x8] sm:$0xff]  ;;  %1506 = vmatprep.mubr.msk.f32.mxu1 %vm518_vm1, %v514_v4  ;;  %1551 = vmatprep.mubr.msk.f32.mxu0 %vm518_vm1, %v514_v4  ;;  %v1887_v8 = vld [vmem:[%s2268_s5 + $0x18] sm:$0xff]  ;;  %s2274_s13 = smov 24   ;;  %s2278_s14 = smov 32   ;;  %vm660_vm2 = vcmask 64512  }
  0x18   : > { %v1592_v5 = vpack.c.bf16 %v1861_v3, %v1859_v2  ;;  %s1747_s18 = smov 40   ;;  %s1748_s19 = smov 48   ;;  %v753_v13 = vld [vmem:[%s2269_s6] sm:$0xff]  ;;  %v754_v14 = vld [vmem:[%s2269_s6 + $0x8] sm:$0xff]  ;;  %v755_v16 = vld [vmem:[%s2269_s6 + $0x10] sm:$0xff]  ;;  %vm665_vm3 = vcmask 195584  }
  0x19   : > { %s1749_s20 = smov 56   ;;  %v1596_v15 = vpack.c.bf16 %v754_v14, %v753_v13  ;;  %v756_v17 = vld [vmem:[%s2269_s6 + $0x18] sm:$0xff]  ;;  %v757_v19 = vld [vmem:[%s2269_s6 + $0x20] sm:$0xff]  ;;  %v758_v20 = vld [vmem:[%s2269_s6 + $0x28] sm:$0xff]  ;;  %vm668_vm4 = vcmask 261120   ;;  %vm671_vm5 = vcmask 326656  }
  0x1a   : > { %1593 = vmatprep.subr.bf16.mxu1 %v1592_v5  ;;  %v1600_v18 = vpack.c.bf16 %v756_v17, %v755_v16  ;;  %v1604_v21 = vpack.c.bf16 %v758_v20, %v757_v19  ;;  %v759_v22 = vld [vmem:[%s2269_s6 + $0x30] sm:$0xff]  ;;  %v760_v23 = vld [vmem:[%s2269_s6 + $0x38] sm:$0xff]  ;;  %v761_v25 = vld [vmem:[%s2269_s6 + $0x40] sm:$0xff]  ;;  %vm674_vm6 = vcmask 392192   ;;  %vm677_vm7 = vcmask 457728   ;;  %s2283_s26 = smov 16  }
  0x1b   : > { %1595 = vmatpush3.bf16.msra.mxu1 %v1592_v5  ;;  %v1608_v24 = vpack.c.bf16 %v760_v23, %v759_v22  ;;  %v762_v26 = vld [vmem:[%s2269_s6 + $0x48] sm:$0xff]  ;;  %v763_v28 = vld [vmem:[%s2269_s6 + $0x50] sm:$0xff]  ;;  %v764_v29 = vld [vmem:[%s2269_s6 + $0x58] sm:$0xff]  ;;  %vm750_vm8 = vcmask 523264   ;;  %s2284_s27 = smov 24   ;;  %s2285_s29 = smov 32  }
  0x1c   : > { %1597 = vmatprep.subr.bf16.mxu1 %v1596_v15  ;;  %v1612_v27 = vpack.c.bf16 %v762_v26, %v761_v25  ;;  %v1616_v30 = vpack.c.bf16 %v764_v29, %v763_v28  ;;  %v765_v31 = vld [vmem:[%s2269_s6 + $0x60] sm:$0xff]  ;;  %v766_v32 = vld [vmem:[%s2269_s6 + $0x68] sm:$0xff]  ;;  %v767_v42 = vld [vmem:[%s2269_s6 + $0x70] sm:$0xff]  ;;  %p1446_p6 = scmp.ne.s32.totalorder %s1733_s15, 3 }
  0x1d   : > { %v1620_v33 = vpack.c.bf16 %v766_v32, %v765_v31  ;;  %v768_v43 = vld [vmem:[%s2269_s6 + $0x78] sm:$0xff]  ;;  %v2018_v59 = vld [vmem:[%s2271_s8 + $0x8] sm:$0xff]  ;;  %v2023_v60 = vld [vmem:[%s2271_s8] sm:$0xff] }
  0x1e   : > { %1507 = vmatmul.mubr.msk.f32.vlgmr.msra.gmra.mrb[0].mxu1 %vm518_vm1, %v1873_v6  ;;  %v1624_v44 = vpack.c.bf16 %v768_v43, %v767_v42 }
  0x1f   : > { %1509 = vmatprep.mubr.msk.f32.mxu1 %vm518_vm1, %v1878_v7  ;;  %1599 = vmatpush3.bf16.msra.mxu1 %v1596_v15 }
  0x20   : > { %1601 = vmatprep.subr.bf16.mxu1 %v1600_v18 }
  0x22   : > { %1510 = vmatmul.mubr.msk.f32.gmra.mrb[2].mxu1 %vm518_vm1, %v1887_v8 }
  0x23   : > { %1603 = vmatpush3.bf16.msra.mxu1 %v1600_v18 }
  0x24   : > { %1605 = vmatprep.subr.bf16.mxu1 %v1604_v21 }
  0x27   : > { %1607 = vmatpush3.bf16.msra.mxu1 %v1604_v21 }
  0x28   : > { %1609 = vmatprep.subr.bf16.mxu1 %v1608_v24 }
  0x2b   : > { %1611 = vmatpush3.bf16.msra.mxu1 %v1608_v24 }
  0x2c   : > { %1613 = vmatprep.subr.bf16.mxu1 %v1612_v27 }
  0x2f   : > { %1615 = vmatpush3.bf16.msra.mxu1 %v1612_v27 }
  0x30   : > { %1617 = vmatprep.subr.bf16.mxu1 %v1616_v30 }
  0x33   : > { %1619 = vmatpush3.bf16.msra.mxu1 %v1616_v30 }
  0x34   : > { %1621 = vmatprep.subr.bf16.mxu1 %v1620_v33 }
  0x37   : > { %1623 = vmatpush3.bf16.msra.mxu1 %v1620_v33 }
  0x38   : > { %1625 = vmatprep.subr.bf16.mxu1 %v1624_v44 }
  0x3b   : > { %1627 = vmatpush3.bf16.msra.mxu1 %v1624_v44 }
  0xf1   : > { %v1891_v9 = vpop.f32.mrb[0].mxu1 }
  0xf2   : > { %v1893_v10 = vpop.f32.mrb[1].mxu1 }
  0xf5   : > { %v1895_v11 = vpop.f32.mrb[2].mxu1 }
  0xf6   : > { %692 = vrot.lane.b32.xlu1 %v1895_v11, %s2276_s30  ;;  %686 = vrot.lane.b32.xlu0 %v1895_v11, %s2280_s12  ;;  %v1901_v12 = vpop.f32.mrb[3].mxu1 }
  0xfa   : > { %698 = vrot.lane.b32.xlu1 %v1895_v11, %s2274_s13  ;;  %684 = vrot.lane.b32.xlu0 %v1901_v12, %s2280_s12 }
  0xfe   : > { %704 = vrot.lane.b32.xlu1 %v1895_v11, %s2278_s14  ;;  %696 = vrot.lane.b32.xlu0 %v1901_v12, %s2274_s13 }
 0x102   : > { %710 = vrot.lane.b32.xlu1 %v1895_v11, %s1747_s18  ;;  %702 = vrot.lane.b32.xlu0 %v1901_v12, %s2278_s14 }
 0x106   : > { %690 = vrot.lane.b32.xlu1 %v1901_v12, %s2276_s30  ;;  %708 = vrot.lane.b32.xlu0 %v1901_v12, %s1747_s18 }
 0x10a   : > { %716 = vrot.lane.b32.xlu1 %v1895_v11, %s1748_s19  ;;  %714 = vrot.lane.b32.xlu0 %v1901_v12, %s1748_s19 }
 0x10e   : > { %722 = vrot.lane.b32.xlu1 %v1895_v11, %s1749_s20  ;;  %720 = vrot.lane.b32.xlu0 %v1901_v12, %s1749_s20 }
 0x112   : > { %620 = vrot.lane.b32.xlu1 %v1891_v9, %s2280_s12  ;;  %618 = vrot.lane.b32.xlu0 %v1893_v10, %s2280_s12 }
 0x116   : > { %626 = vrot.lane.b32.xlu1 %v1891_v9, %s2276_s30  ;;  %624 = vrot.lane.b32.xlu0 %v1893_v10, %s2276_s30 }
 0x11a   : > { %632 = vrot.lane.b32.xlu1 %v1891_v9, %s2274_s13  ;;  %630 = vrot.lane.b32.xlu0 %v1893_v10, %s2274_s13 }
 0x11e   : > { %638 = vrot.lane.b32.xlu1 %v1891_v9, %s2278_s14  ;;  %636 = vrot.lane.b32.xlu0 %v1893_v10, %s2278_s14  ;;  %s1750_s14 = smov 64  }
 0x122   : > { %644 = vrot.lane.b32.xlu1 %v1891_v9, %s1747_s18  ;;  %642 = vrot.lane.b32.xlu0 %v1893_v10, %s1747_s18 }
 0x126   : > { %650 = vrot.lane.b32.xlu1 %v1891_v9, %s1748_s19  ;;  %648 = vrot.lane.b32.xlu0 %v1893_v10, %s1748_s19 }
 0x12a   : > { %656 = vrot.lane.b32.xlu1 %v1891_v9, %s1749_s20  ;;  %654 = vrot.lane.b32.xlu0 %v1893_v10, %s1749_s20 }
 0x168   : > { %v693_v34 = vpop.permute.xlu1 %692  ;;  %v687_v35 = vpop.permute.xlu0 %686 }
 0x169   : > { %v727_v48 = vsel %vm660_vm2, %v1895_v11, %v687_v35 }
 0x16a   : > { %v729_v52 = vsel %vm518_vm1, %v727_v48, %v693_v34 }
 0x16c   : > { %v699_v36 = vpop.permute.xlu1 %698  ;;  %v685_v37 = vpop.permute.xlu0 %684 }
 0x16d   : > { %v726_v45 = vsel %vm660_vm2, %v1901_v12, %v685_v37  ;;  %v731_v55 = vsel %vm665_vm3, %v729_v52, %v699_v36 }
 0x170   : > { %v705_v38 = vpop.permute.xlu1 %704  ;;  %v697_v39 = vpop.permute.xlu0 %696 }
 0x171   : > { %v733_v57 = vsel %vm668_vm4, %v731_v55, %v705_v38 }
 0x174   : > { %v711_v40 = vpop.permute.xlu1 %710  ;;  %v703_v41 = vpop.permute.xlu0 %702 }
 0x175   : > { %v735_v58 = vsel %vm671_vm5, %v733_v57, %v711_v40 }
 0x178   : > { %v691_v46 = vpop.permute.xlu1 %690  ;;  %v709_v47 = vpop.permute.xlu0 %708 }
 0x179   : > { %v728_v49 = vsel %vm518_vm1, %v726_v45, %v691_v46  ;;  %v513_v46 = vld [vmem:[%s1835_s22 + $0x8] sm:$0xff] }
 0x17a   : > { %v730_v50 = vsel %vm665_vm3, %v728_v49, %v697_v39 }
 0x17b   : > { %v732_v51 = vsel %vm668_vm4, %v730_v50, %v703_v41 }
 0x17c   : > { %v717_v53 = vpop.permute.xlu1 %716  ;;  %v715_v54 = vpop.permute.xlu0 %714  ;;  %v734_v56 = vsel %vm671_vm5, %v732_v51, %v709_v47  ;;  %v512_v47 = vld [vmem:[%s1835_s22] sm:$0xff]  ;;  %s2282_s22 = smov 8  }
 0x17d   : > { %v737_v61 = vsel %vm674_vm6, %v735_v58, %v717_v53  ;;  %v736_v62 = vsel %vm674_vm6, %v734_v56, %v715_v54 }
 0x180   : > { %v723_v63 = vpop.permute.xlu1 %722  ;;  %v721_v0 = vpop.permute.xlu0 %720 }
 0x181   : > { %v739_v1 = vsel %vm677_vm7, %v737_v61, %v723_v63  ;;  %v738_v4 = vsel %vm677_vm7, %v736_v62, %v721_v0 }
 0x182   : > { %v741_v5 = vmul.f32 %v739_v1, %v2018_v59  ;;  %v740_v11 = vmul.f32 %v738_v4, %v2023_v60 }
 0x184   : > { %v1697_v12 = vpack.i.bf16 %v741_v5, %v740_v11  ;;  %v621_v13 = vpop.permute.xlu1 %620  ;;  %v619_v14 = vpop.permute.xlu0 %618 }
 0x185   : > { %v662_v25 = vsel %vm660_vm2, %v1891_v9, %v621_v13  ;;  %v661_v26 = vsel %vm660_vm2, %v1893_v10, %v619_v14  ;;  %v1080_v13 = vld [vmem:[%s2270_s7 + $0x18] sm:$0xff] }
 0x186   : > { %1698 = vrot.lane.b32.xlu0 %v1697_v12, %s1750_s14 }
 0x188   : > { %v627_v15 = vpop.permute.xlu1 %626  ;;  %v625_v16 = vpop.permute.xlu0 %624 }
 0x189   : > { %v664_v27 = vsel %vm518_vm1, %v662_v25, %v627_v15  ;;  %v663_v28 = vsel %vm518_vm1, %v661_v26, %v625_v16  ;;  %v1081_v15 = vld [vmem:[%s2270_s7 + $0x20] sm:$0xff]  ;;  %v1082_v16 = vld [vmem:[%s2270_s7 + $0x28] sm:$0xff]  ;;  %v1088_v25 = vld [vmem:[%s2270_s7 + $0x58] sm:$0xff] }
 0x18c   : > { %v633_v17 = vpop.permute.xlu1 %632  ;;  %v631_v18 = vpop.permute.xlu0 %630 }
 0x18d   : > { %v667_v29 = vsel %vm665_vm3, %v664_v27, %v633_v17  ;;  %v666_v30 = vsel %vm665_vm3, %v663_v28, %v631_v18  ;;  %v1640_v17 = vpack.c.bf16 %v1082_v16, %v1081_v15  ;;  %v1083_v18 = vld [vmem:[%s2270_s7 + $0x30] sm:$0xff]  ;;  %v1089_v27 = vld [vmem:[%s2270_s7 + $0x60] sm:$0xff] }
 0x190   : > { %v639_v19 = vpop.permute.xlu1 %638  ;;  %v637_v20 = vpop.permute.xlu0 %636 }
 0x191   : > { %v670_v31 = vsel %vm668_vm4, %v667_v29, %v639_v19  ;;  %v669_v32 = vsel %vm668_vm4, %v666_v30, %v637_v20  ;;  %v1084_v19 = vld [vmem:[%s2270_s7 + $0x38] sm:$0xff] }
 0x192   : > { %v1644_v20 = vpack.c.bf16 %v1084_v19, %v1083_v18 }
 0x194   : > { %v645_v21 = vpop.permute.xlu1 %644  ;;  %v643_v22 = vpop.permute.xlu0 %642 }
 0x195   : > { %v673_v35 = vsel %vm671_vm5, %v670_v31, %v645_v21  ;;  %v672_v9 = vsel %vm671_vm5, %v669_v32, %v643_v22  ;;  %v1085_v21 = vld [vmem:[%s2270_s7 + $0x40] sm:$0xff]  ;;  %v1086_v22 = vld [vmem:[%s2270_s7 + $0x48] sm:$0xff] }
 0x198   : > { %v651_v23 = vpop.permute.xlu1 %650  ;;  %v649_v24 = vpop.permute.xlu0 %648 }
 0x199   : > { %v676_v10 = vsel %vm674_vm6, %v673_v35, %v651_v23  ;;  %v675_v36 = vsel %vm674_vm6, %v672_v9, %v649_v24  ;;  %v1648_v23 = vpack.c.bf16 %v1086_v22, %v1085_v21  ;;  %v1087_v24 = vld [vmem:[%s2270_s7 + $0x50] sm:$0xff] }
 0x19a   : > { %v1652_v26 = vpack.c.bf16 %v1088_v25, %v1087_v24 }
 0x19c   : > { %v657_v33 = vpop.permute.xlu1 %656  ;;  %v655_v34 = vpop.permute.xlu0 %654 }
 0x19d   : > { %v679_v37 = vsel %vm677_vm7, %v676_v10, %v657_v33  ;;  %v678_v38 = vsel %vm677_vm7, %v675_v36, %v655_v34  ;;  %v1091_v10 = vld [vmem:[%s2270_s7 + $0x70] sm:$0xff]  ;;  %v1092_v36 = vld [vmem:[%s2270_s7 + $0x78] sm:$0xff] }
 0x19e   : > { %v681_v40 = vmul.f32 %v679_v37, %v2018_v59  ;;  %v680_v41 = vmul.f32 %v678_v38, %v2023_v60  ;;  %v1660_v38 = vpack.c.bf16 %v1092_v36, %v1091_v10  ;;  %v859_v36 = vld [vmem:[%s1840_s25 + $0x8] sm:$0xff] }
 0x1f8   : > { %v1699_v39 = vpop.permute.xlu0 %1698 }
 0x1f9   : > { %v1701_v42 = vunpack.i.h.bf16 %v1699_v39  ;;  %v1700_v43 = vunpack.i.l.bf16 %v1699_v39 }
 0x1fb   : > { %v751_v44 = vsel %vm750_vm8, %v680_v41, %v1700_v43  ;;  %v752_v45 = vsel %vm750_vm8, %v681_v40, %v1701_v42 }
 0x1fc   : > { %1544 = vmatprep.mubr.f32.mxu1 %v751_v44 }
 0x1fd   : > { %1545 = vmatmul.mubr.f32.vlgmr.msra.gmra.mrb[4].mxu1 %v752_v45 }
 0x2d0   : > { %v1546_v48 = vpop.f32.mrb[4].mxu1 }
 0x2d1   : > { %v845_v49 = vadd.f32 %v1546_v48, %v513_v46  ;;  %v835_v50 = vpop.f32.mrb[5].mxu1 }
 0x2d2   : > { %v844_v51 = vadd.f32 %v835_v50, %v512_v47 }
 0x2d3   : > { %v1441_v52 = vmul.f32 -1.442695, %v845_v49 }
 0x2d4   : > { %v1440_v53 = vmul.f32 -1.442695, %v844_v51 }
 0x2d5   : > { %1707 = vpow2.f32 %v1441_v52 }
 0x2d6   : > { %1709 = vpow2.f32 %v1440_v53 }
 0x2df   : > { %v1708_v54 = vpop.eup %1707 }
 0x2e0   : > { %v1710_v55 = vpop.eup %1709  ;;  %v853_v56 = vadd.f32 1.0, %v1708_v54 }
 0x2e1   : > { %v852_v57 = vadd.f32 1.0, %v1710_v55 }
 0x2e2   : > { %1711 = vrcp.f32 %v853_v56 }
 0x2e3   : > { %1713 = vrcp.f32 %v852_v57 }
 0x2ec   : > { %v2054_v58 = vpop.eup %1711 }
 0x2ed   : > { %v2056_v61 = vpop.eup %1713  ;;  %v861_v62 = vmul.f32 %v2054_v58, %v1861_v3 }
 0x2ee   : > { %v860_v63 = vmul.f32 %v2056_v61, %v1859_v2 }
 0x2f0   : > { %v1628_v0 = vpack.c.bf16 %v861_v62, %v860_v63 }
 0x2f2   : > { %1629 = vmatprep.subr.bf16.mxu0 %v1628_v0 }
 0x2f3   : > { %1631 = vmatpush3.bf16.msra.mxu0 %v1628_v0 }
 0x2f6   : > { %1552 = vmatmul.mubr.msk.f32.vlgmr.msra.gmra.mrb[0].mxu0 %vm518_vm1, %v1873_v6  ;;  %v1077_v6 = vld [vmem:[%s2270_s7] sm:$0xff] }
 0x2f7   : > { %1554 = vmatprep.mubr.msk.f32.mxu0 %vm518_vm1, %v1878_v7  ;;  %v1078_v7 = vld [vmem:[%s2270_s7 + $0x8] sm:$0xff] }
 0x2f8   : > { %v1632_v12 = vpack.c.bf16 %v1078_v7, %v1077_v6 }
 0x2fa   : > { %1555 = vmatmul.mubr.msk.f32.gmra.mrb[2].mxu0 %vm518_vm1, %v1887_v8  ;;  %v1079_v8 = vld [vmem:[%s2270_s7 + $0x10] sm:$0xff]  ;;  %1633 = vmatprep.subr.bf16.mxu0 %v1632_v12 }
 0x2fb   : > { %v1636_v14 = vpack.c.bf16 %v1080_v13, %v1079_v8  ;;  %1635 = vmatpush3.bf16.msra.mxu0 %v1632_v12 }
 0x2fd   : > { %1637 = vmatprep.subr.bf16.mxu0 %v1636_v14 }
 0x2ff   : > { %1639 = vmatpush3.bf16.msra.mxu0 %v1636_v14 }
 0x300   : > { %1641 = vmatprep.subr.bf16.mxu0 %v1640_v17 }
 0x303   : > { %1643 = vmatpush3.bf16.msra.mxu0 %v1640_v17 }
 0x304   : > { %1645 = vmatprep.subr.bf16.mxu0 %v1644_v20 }
 0x307   : > { %1647 = vmatpush3.bf16.msra.mxu0 %v1644_v20 }
 0x308   : > { %1649 = vmatprep.subr.bf16.mxu0 %v1648_v23 }
 0x30b   : > { %1651 = vmatpush3.bf16.msra.mxu0 %v1648_v23 }
 0x30c   : > { %1653 = vmatprep.subr.bf16.mxu0 %v1652_v26 }
 0x30f   : > { %1655 = vmatpush3.bf16.msra.mxu0 %v1652_v26 }
 0x3c9   : > { %v2068_v1 = vpop.f32.mrb[0].mxu0 }
 0x3ca   : > { %v2070_v4 = vpop.f32.mrb[1].mxu0 }
 0x3cd   : > { %v2072_v5 = vpop.f32.mrb[2].mxu0 }
 0x3ce   : > { %1011 = vrot.lane.b32.xlu0 %v2072_v5, %s2282_s22  ;;  %v2076_v11 = vpop.f32.mrb[3].mxu0 }
 0x3cf   : > { %1009 = vrot.lane.b32.xlu1 %v2076_v11, %s2282_s22 }
 0x3d2   : > { %1017 = vrot.lane.b32.xlu0 %v2072_v5, %s2283_s26 }
 0x3d3   : > { %1015 = vrot.lane.b32.xlu1 %v2076_v11, %s2283_s26 }
 0x3d6   : > { %1023 = vrot.lane.b32.xlu0 %v2072_v5, %s2284_s27 }
 0x3d7   : > { %1021 = vrot.lane.b32.xlu1 %v2076_v11, %s2284_s27 }
 0x3da   : > { %1029 = vrot.lane.b32.xlu0 %v2072_v5, %s2285_s29 }
 0x3db   : > { %1027 = vrot.lane.b32.xlu1 %v2076_v11, %s2285_s29 }
 0x3de   : > { %1035 = vrot.lane.b32.xlu0 %v2072_v5, %s1747_s18 }
 0x3df   : > { %1033 = vrot.lane.b32.xlu1 %v2076_v11, %s1747_s18 }
 0x3e2   : > { %1041 = vrot.lane.b32.xlu0 %v2072_v5, %s1748_s19 }
 0x3e3   : > { %1039 = vrot.lane.b32.xlu1 %v2076_v11, %s1748_s19 }
 0x3e6   : > { %1047 = vrot.lane.b32.xlu0 %v2072_v5, %s1749_s20 }
 0x3e7   : > { %1045 = vrot.lane.b32.xlu1 %v2076_v11, %s1749_s20 }
 0x3ea   : > { %951 = vrot.lane.b32.xlu0 %v2068_v1, %s2282_s22 }
 0x3eb   : > { %949 = vrot.lane.b32.xlu1 %v2070_v4, %s2282_s22 }
 0x3ee   : > { %957 = vrot.lane.b32.xlu0 %v2068_v1, %s2283_s26 }
 0x3ef   : > { %955 = vrot.lane.b32.xlu1 %v2070_v4, %s2283_s26 }
 0x3f2   : > { %963 = vrot.lane.b32.xlu0 %v2068_v1, %s2284_s27 }
 0x3f3   : > { %961 = vrot.lane.b32.xlu1 %v2070_v4, %s2284_s27 }
 0x3f6   : > { %969 = vrot.lane.b32.xlu0 %v2068_v1, %s2285_s29 }
 0x3f7   : > { %967 = vrot.lane.b32.xlu1 %v2070_v4, %s2285_s29 }
 0x3fa   : > { %975 = vrot.lane.b32.xlu0 %v2068_v1, %s1747_s18 }
 0x3fb   : > { %973 = vrot.lane.b32.xlu1 %v2070_v4, %s1747_s18 }
 0x3fe   : > { %981 = vrot.lane.b32.xlu0 %v2068_v1, %s1748_s19 }
 0x3ff   : > { %979 = vrot.lane.b32.xlu1 %v2070_v4, %s1748_s19 }
 0x402   : > { %987 = vrot.lane.b32.xlu0 %v2068_v1, %s1749_s20 }
 0x403   : > { %985 = vrot.lane.b32.xlu1 %v2070_v4, %s1749_s20 }
 0x406   : > { %1174 = vrot.lane.b32.xlu0 %v1859_v2, %s2282_s22  ;;  %v1090_v2 = vld [vmem:[%s2270_s7 + $0x68] sm:$0xff] }
 0x407   : > { %v1656_v28 = vpack.c.bf16 %v1090_v2, %v1089_v27 }
 0x409   : > { %1657 = vmatprep.subr.bf16.mxu0 %v1656_v28 }
 0x40a   : > { %1659 = vmatpush3.bf16.msra.mxu0 %v1656_v28 }
 0x40b   : > { %1661 = vmatprep.subr.bf16.mxu0 %v1660_v38 }
 0x40e   : > { %1663 = vmatpush3.bf16.msra.mxu0 %v1660_v38 }
 0x440   : > { %v1012_v29 = vpop.permute.xlu0 %1011 }
 0x441   : > { %v1010_v30 = vpop.permute.xlu1 %1009  ;;  %v1052_v40 = vsel %vm660_vm2, %v2072_v5, %v1012_v29 }
 0x442   : > { %v1051_v41 = vsel %vm660_vm2, %v2076_v11, %v1010_v30 }
 0x444   : > { %v1018_v31 = vpop.permute.xlu0 %1017 }
 0x445   : > { %v1016_v32 = vpop.permute.xlu1 %1015  ;;  %v1054_v42 = vsel %vm518_vm1, %v1052_v40, %v1018_v31 }
 0x446   : > { %v1053_v44 = vsel %vm518_vm1, %v1051_v41, %v1016_v32 }
 0x448   : > { %v1024_v33 = vpop.permute.xlu0 %1023 }
 0x449   : > { %v1022_v34 = vpop.permute.xlu1 %1021  ;;  %v1056_v45 = vsel %vm665_vm3, %v1054_v42, %v1024_v33  ;;  %v1210_v42 = vld [vmem:[%s1845_s28] sm:$0xff] }
 0x44a   : > { %v1055_v47 = vsel %vm665_vm3, %v1053_v44, %v1022_v34 }
 0x44c   : > { %v1030_v35 = vpop.permute.xlu0 %1029 }
 0x44d   : > { %v1028_v9 = vpop.permute.xlu1 %1027  ;;  %v1058_v48 = vsel %vm668_vm4, %v1056_v45, %v1030_v35 }
 0x44e   : > { %v1057_v49 = vsel %vm668_vm4, %v1055_v47, %v1028_v9 }
 0x450   : > { %v1036_v37 = vpop.permute.xlu0 %1035 }
 0x451   : > { %v1034_v39 = vpop.permute.xlu1 %1033  ;;  %v1060_v50 = vsel %vm671_vm5, %v1058_v48, %v1036_v37  ;;  %v858_v37 = vld [vmem:[%s1840_s25] sm:$0xff]  ;;  %s1751_s25 = smov 120  }
 0x452   : > { %v1059_v51 = vsel %vm671_vm5, %v1057_v49, %v1034_v39  ;;  %v1183_v49 = vsub.f32 1.0, %v2054_v58 }
 0x454   : > { %v1042_v43 = vpop.permute.xlu0 %1041 }
 0x455   : > { %v1040_v46 = vpop.permute.xlu1 %1039  ;;  %v1062_v52 = vsel %vm674_vm6, %v1060_v50, %v1042_v43 }
 0x456   : > { %v1061_v54 = vsel %vm674_vm6, %v1059_v51, %v1040_v46  ;;  %v1182_v51 = vsub.f32 1.0, %v2056_v61 }
 0x458   : > { %v1048_v53 = vpop.permute.xlu0 %1047 }
 0x459   : > { %v1064_v55 = vsel %vm677_vm7, %v1062_v52, %v1048_v53  ;;  %v1046_v56 = vpop.permute.xlu1 %1045 }
 0x45a   : > { %v1066_v57 = vmul.f32 %v1064_v55, %v2018_v59  ;;  %v1063_v62 = vsel %vm677_vm7, %v1061_v54, %v1046_v56 }
 0x45b   : > { %v1065_v63 = vmul.f32 %v1063_v62, %v2023_v60 }
 0x45c   : > { %v952_v5 = vpop.permute.xlu0 %951 }
 0x45d   : > { %v1702_v0 = vpack.i.bf16 %v1066_v57, %v1065_v63  ;;  %v950_v11 = vpop.permute.xlu1 %949  ;;  %v992_v19 = vsel %vm660_vm2, %v2068_v1, %v952_v5 }
 0x45e   : > { %v991_v20 = vsel %vm660_vm2, %v2070_v4, %v950_v11 }
 0x45f   : > { %1703 = vrot.lane.b32.xlu1 %v1702_v0, %s1750_s14  ;;  %s2225_s14 = sld [smem:[#allocation3]] }
 0x460   : > { %v958_v6 = vpop.permute.xlu0 %957 }
 0x461   : > { %v956_v7 = vpop.permute.xlu1 %955 }
 0x462   : > { %v993_v21 = vsel %vm518_vm1, %v991_v20, %v956_v7 }
 0x463   : > { %1176 = vrot.lane.b32.xlu1 %v1861_v3, %s2282_s22  ;;  %v994_v3 = vsel %vm518_vm1, %v992_v19, %v958_v6 }
 0x464   : > { %v964_v8 = vpop.permute.xlu0 %963 }
 0x465   : > { %v962_v12 = vpop.permute.xlu1 %961  ;;  %v996_v22 = vsel %vm665_vm3, %v994_v3, %v964_v8  ;;  %s1209_s21 = ssub.f32 1.0, %s2225_s14  ;;  %v1206_v57 = vstv %s2225_s14 }
 0x466   : > { %v995_v23 = vsel %vm665_vm3, %v993_v21, %v962_v12 }
 0x467   : > { %v1212_v41 = vstv %s1209_s21 }
 0x468   : > { %v970_v13 = vpop.permute.xlu0 %969  ;;  %v1213_v46 = vmul.f32 %v1212_v41, %v1210_v42 }
 0x469   : > { %v968_v14 = vpop.permute.xlu1 %967  ;;  %v998_v24 = vsel %vm668_vm4, %v996_v22, %v970_v13 }
 0x46a   : > { %v997_v25 = vsel %vm668_vm4, %v995_v23, %v968_v14 }
 0x46c   : > { %v976_v15 = vpop.permute.xlu0 %975 }
 0x46d   : > { %v974_v16 = vpop.permute.xlu1 %973  ;;  %v1000_v1 = vsel %vm671_vm5, %v998_v24, %v976_v15 }
 0x46e   : > { %v999_v4 = vsel %vm671_vm5, %v997_v25, %v974_v16 }
 0x470   : > { %v982_v17 = vpop.permute.xlu0 %981 }
 0x471   : > { %v980_v18 = vpop.permute.xlu1 %979  ;;  %v1002_v2 = vsel %vm674_vm6, %v1000_v1, %v982_v17 }
 0x472   : > { %v1001_v28 = vsel %vm674_vm6, %v999_v4, %v980_v18 }
 0x474   : > { %v988_v26 = vpop.permute.xlu0 %987 }
 0x475   : > { %v986_v27 = vpop.permute.xlu1 %985  ;;  %v1004_v29 = vsel %vm677_vm7, %v1002_v2, %v988_v26 }
 0x476   : > { %v1003_v30 = vsel %vm677_vm7, %v1001_v28, %v986_v27  ;;  %v1006_v32 = vmul.f32 %v1004_v29, %v2018_v59 }
 0x477   : > { %v1005_v33 = vmul.f32 %v1003_v30, %v2023_v60  ;;  %v1211_v60 = vld [vmem:[%s1845_s28 + $0x8] sm:$0xff] }
 0x478   : > { %v1214_v45 = vmul.f32 %v1212_v41, %v1211_v60  ;;  %v1175_v48 = vpop.permute.xlu0 %1174 }
 0x479   : > { %v1180_v55 = vmul.f32 %v2056_v61, %v1175_v48 }
 0x4d1   : > { %v1704_v31 = vpop.permute.xlu1 %1703 }
 0x4d2   : > { %v1706_v34 = vunpack.i.h.bf16 %v1704_v31  ;;  %v1705_v35 = vunpack.i.l.bf16 %v1704_v31 }
 0x4d4   : > { %v1075_v9 = vsel %vm750_vm8, %v1005_v33, %v1705_v35  ;;  %v1076_v10 = vsel %vm750_vm8, %v1006_v32, %v1706_v34 }
 0x4d5   : > { %1589 = vmatprep.mubr.f32.mxu0 %v1075_v9  ;;  %v1177_v47 = vpop.permute.xlu1 %1176 }
 0x4d6   : > { %1590 = vmatmul.mubr.f32.vlgmr.msra.gmra.mrb[4].mxu0 %v1076_v10  ;;  %v1181_v52 = vmul.f32 %v2054_v58, %v1177_v47 }
 0x5a9   : > { %v1591_v38 = vpop.f32.mrb[4].mxu0 }
 0x5aa   : > { %v1169_v39 = vadd.f32 %v1591_v38, %v859_v36  ;;  %v1159_v59 = vpop.f32.mrb[5].mxu0 }
 0x5ab   : > { %v1168_v40 = vadd.f32 %v1159_v59, %v858_v37 }
 0x5ac   : > { %1715 = vtanh.f32 %v1169_v39 }
 0x5ad   : > { %1717 = vtanh.f32 %v1168_v40 }
 0x5b6   : > { %v1716_v43 = vpop.eup %1715 }
 0x5b7   : > { %v1718_v44 = vpop.eup %1717  ;;  %1188 = vrot.lane.b32.xlu1 %v1716_v43, %s2282_s22 }
 0x5b8   : > { %1186 = vrot.lane.b32.xlu0 %v1718_v44, %s2282_s22 }
 0x5bb   : > { %1219 = vrot.lane.b32.xlu1 %v1214_v45, %s2282_s22 }
 0x5bc   : > { %1217 = vrot.lane.b32.xlu0 %v1213_v46, %s2282_s22 }
 0x629   : > { %v1189_v50 = vpop.permute.xlu1 %1188 }
 0x62a   : > { %v1193_v53 = vmul.f32 %v1189_v50, %v1183_v49  ;;  %v1187_v54 = vpop.permute.xlu0 %1186 }
 0x62b   : > { %v1192_v56 = vmul.f32 %v1187_v54, %v1182_v51 }
 0x62c   : > { %v1195_v62 = vadd.f32 %v1193_v53, %v1181_v52 }
 0x62d   : > { %v1194_v63 = vadd.f32 %v1192_v56, %v1180_v55  ;;  %v1220_v0 = vpop.permute.xlu1 %1219 }
 0x62e   : > { %1200 = vrot.lane.b32.xlu1 %v1195_v62, %s1751_s25  ;;  %v1208_v5 = vmul.f32 %v1206_v57, %v1195_v62  ;;  %v1218_v11 = vpop.permute.xlu0 %1217 }
 0x62f   : > { %1198 = vrot.lane.b32.xlu0 %v1194_v63, %s1751_s25  ;;  %v1207_v6 = vmul.f32 %v1206_v57, %v1194_v63 }
 0x630   : > { %v1224_v7 = vadd.f32 %v1220_v0, %v1208_v5 }
 0x631   : > { %v1223_v8 = vadd.f32 %v1218_v11, %v1207_v6 }
 0x632   : > { %1229 = vrot.lane.b32.xlu1 %v1224_v7, %s1751_s25 }
 0x633   : > { %1227 = vrot.lane.b32.xlu0 %v1223_v8, %s1751_s25 }
 0x6a0   : > { %v1201_v58 = vpop.permute.xlu1 %1200  ;;  %1238 = sbr.rel (%p1446_p6) target bundleno = 1703 (0x6a7), region = 64 }
 0x6a1   : > { %1205 = vst.msk [vmem:[#allocation2 + $0x8] sm:$0xff] %vm660_vm2, %v1201_v58  ;;  %v1199_v61 = vpop.permute.xlu0 %1198  ;;  %1240 = vst.msk [vmem:[%s2273_s10 + $0x8] sm:$0xff] (!%p1446_p6), %vm660_vm2, %v1201_v58 }
 0x6a2   : > { %1204 = vst.msk [vmem:[#allocation2] sm:$0xff] %vm660_vm2, %v1199_v61  ;;  %1239 = vst.msk [vmem:[%s2273_s10] sm:$0xff] (!%p1446_p6), %vm660_vm2, %v1199_v61 }
 0x6a4   : > { %v1230_v12 = vpop.permute.xlu1 %1229 }
 0x6a5   : > { %1234 = vst.msk [vmem:[%s1850_s11 + $0x8] sm:$0xff] %vm660_vm2, %v1230_v12  ;;  %v1228_v13 = vpop.permute.xlu0 %1227 }
 0x6a6   : > { %1233 = vst.msk [vmem:[%s1850_s11] sm:$0xff] %vm660_vm2, %v1228_v13 }
 0x6a7 PF: > { %s22_s17 = sadd.s32 1, %s1741_s17   ;;  %s2286_s15 = smov %s1737_s16 }
 0x6a8   : > { %p19_p7 = scmp.ge.s32.totalorder %s22_s17, 6   ;;  %s2287_s16 = smov %s2289_s0 }
 0x6aa   :  { %21 = sbr.rel (!%p19_p7) target bundleno = 2 (0x2), region = 115 }

</bundles_post_ra>
